<compile_context>
chip_gen: v6e
topology: v6e:2x2x1
jax: 0.10.0
libtpu: 0.0.40
codegen_flags: <defaults>
</compile_context>

<pallas_src>
import numpy as np
import jax
import jax.numpy as jnp
from jax import lax
from jax.experimental import pallas as pl
from jax.experimental.pallas import tpu as pltpu


def _make_mrconv_kernel(*, tile_n, k_total, k_block, center_is_self):
    """Builds the per-(batch, node-tile) kernel body; K is looped statically inside."""

    def kernel(ei_ref, xg_ref, wT_ref, b_ref, o_ref):
        # ei_ref : (1, 1, 2, K*TN) int32  row 0 = edge_index[0] (neighbor j), row 1 = edge_index[1] (center i)
        # xg_ref : (1, C, Np)      bf16   full node features of this batch element (gather source)
        # wT_ref : (Cout, 2C)      bf16   merged conv weight, columns = [x-channels | rel-channels]
        # b_ref  : (Cout, 1)       f32
        # o_ref  : (1, Cout, TN)   out dtype
        xg = xg_ref[0]                                   # (C, Np) bf16
        n_full = xg.shape[1]
        idx = ei_ref[0, 0]                               # (2, K*TN) int32

        # Raw-x tile of this output block, sliced from the resident full-x block
        # (replaces the duplicated xt input stream of v1).
        if tile_n == n_full:
            xt = xg                                      # single-tile case: whole block
        else:
            start = pl.program_id(1) * tile_n
            if tile_n % 128 == 0:
                start = pl.multiple_of(start, 128)
            xt = xg_ref[0, :, pl.ds(start, tile_n)]      # (C, TN) bf16

        # Max-relative gather: one wide one-hot matmul per K-chunk, max-reduced over
        # lane-aligned TN-wide slices of the result.
        rel = None
        for k0 in range(0, k_total, k_block):
            kb = min(k_block, k_total - k0)
            idx_blk = idx[:, k0 * tile_n:(k0 + kb) * tile_n]                  # (2, kb*TN)
            row = lax.broadcasted_iota(jnp.int32, (n_full, kb * tile_n), 0)
            oh = (row == idx_blk[0:1, :]).astype(jnp.bfloat16)                # neighbor one-hot
            if not center_is_self:
                oh = oh - (row == idx_blk[1:2, :]).astype(jnp.bfloat16)       # minus center one-hot
            wide = jnp.dot(xg, oh, preferred_element_type=jnp.float32)        # (C, kb*TN) f32
            for kk in range(kb):
                chunk = wide[:, kk * tile_n:(kk + 1) * tile_n]                # (C, TN)
                rel = chunk if rel is None else jnp.maximum(rel, chunk)
        if center_is_self:
            # center features are constant over k: max_k(x_j - x_i) == max_k(x_j) - x_i
            rel = rel - xt.astype(jnp.float32)

        # Grouped 1x1x1 conv (groups baked into wT) + bias + ReLU as one merged MXU matmul.
        feat = jnp.concatenate([xt.astype(jnp.float32), rel], axis=0)         # (2C, TN) f32
        pre = jnp.dot(wT_ref[...], feat.astype(jnp.bfloat16),
                      preferred_element_type=jnp.float32) + b_ref[...]        # (Cout, TN) f32
        o_ref[0] = jnp.maximum(pre, 0.0).astype(o_ref.dtype)

    return kernel


def graph_conv_forward(x_nchw, edge_index, wT, bias, *, tile_n=None, k_block=None,
                       center_is_self=False, out_dtype=jnp.float32):
    """x_nchw: (B, C, N, 1) f32, edge_index: (2, B, N, K) i32 -> (B, Cout, N, 1, 1) out_dtype.

    center_is_self=True enables the fast path for graphs where edge_index[1][b, n, k] == n
    (the standard dense-kNN construction); it is mathematically identical to the general path.
    """
    B, C, N, _ = x_nchw.shape
    K = edge_index.shape[-1]
    Cout = wT.shape[0]
    assert K >= 1 and wT.shape == (Cout, 2 * C)

    # Pad N so output stores stay lane-dense (padded nodes gather node 0 and are sliced off).
    n_pad = N if N <= 128 else ((N + 127) // 128) * 128
    if n_pad != N:
        x_nchw = jnp.pad(x_nchw, ((0, 0), (0, 0), (0, n_pad - N), (0, 0)))
        edge_index = jnp.pad(edge_index, ((0, 0), (0, 0), (0, n_pad - N), (0, 0)))

    if tile_n is None:
        tile_n = n_pad
        for cand in (512, 256, 128):
            if n_pad % cand == 0:
                tile_n = cand
                break
        # keep both v7x TensorCores busy for single-batch / single-tile shapes
        if B * (n_pad // tile_n) < 2 and tile_n % 256 == 0:
            tile_n //= 2
    assert n_pad % tile_n == 0
    nt = n_pad // tile_n

    if k_block is None:
        # bound the (Np, Kblk*TN) bf16 one-hot slab to ~8 MiB
        k_block = max(1, min(K, (8 * 1024 * 1024) // max(1, n_pad * tile_n * 2)))

    x_cn = x_nchw[..., 0].astype(jnp.bfloat16)                           # (B, C, Np) channel-major
    ei = edge_index.astype(jnp.int32)                                    # (2, B, Np, K)
    ei = jnp.transpose(ei, (1, 0, 3, 2)).reshape(B, 2, K, nt, tile_n)    # (B, 2, K, nt, TN)
    ei = jnp.transpose(ei, (0, 3, 1, 2, 4)).reshape(B, nt, 2, K * tile_n)  # flat col = k*TN + t
    wT_b = wT.astype(jnp.bfloat16)
    bias2d = bias.reshape(Cout, 1).astype(jnp.float32)

    # VMEM budget: double-buffered inputs/outputs + in-kernel one-hot / gather temporaries.
    out_itemsize = jnp.dtype(out_dtype).itemsize
    need = (2 * C * n_pad * 2 +                      # x block (double-buffered)
            2 * 2 * K * tile_n * 4 +                 # edge-index block
            2 * Cout * tile_n * out_itemsize +       # output block
            Cout * 2 * C * 2 + Cout * 4 +            # weights + bias
            n_pad * k_block * tile_n * 2 +           # one-hot slab
            C * k_block * tile_n * 4 +               # wide gather result
            6 * C * tile_n * 4 + Cout * tile_n * 4)  # xt / rel / feat / pre temporaries
    vmem_limit = int(min(96 * 1024 * 1024, max(32 * 1024 * 1024, 2 * need)))

    kernel = _make_mrconv_kernel(tile_n=tile_n, k_total=K, k_block=k_block,
                                 center_is_self=center_is_self)
    out = pl.pallas_call(
        kernel,
        out_shape=jax.ShapeDtypeStruct((B, Cout, n_pad), out_dtype),
        grid_spec=pltpu.PrefetchScalarGridSpec(
            num_scalar_prefetch=0,
            grid=(B, nt),
            in_specs=[
                pl.BlockSpec((1, 1, 2, K * tile_n), lambda b, j: (b, j, 0, 0)),
                # full-x block only changes with b; Pallas skips the re-DMA across j steps.
                # TODO(synk): on v7x (64 MiB VMEM) consider pipeline_mode=pl.Buffered(1) here.
                pl.BlockSpec((1, C, n_pad),         lambda b, j: (b, 0, 0)),
                pl.BlockSpec((Cout, 2 * C),         lambda b, j: (0, 0)),
                pl.BlockSpec((Cout, 1),             lambda b, j: (0, 0)),
            ],
            out_specs=pl.BlockSpec((1, Cout, tile_n), lambda b, j: (b, 0, j)),
        ),
        compiler_params=pltpu.CompilerParams(
            dimension_semantics=("parallel", "parallel"),
            vmem_limit_bytes=vmem_limit,
        ),
    )(ei, x_cn, wT_b, bias2d)

    out = out[:, :, :N]
    return out[..., None, None]                       # (B, Cout, N, 1, 1), Conv3d path


def init_params(key, in_channels, out_channels, groups=4):
    """Deterministic init of BasicConv Conv3d(2C, Cout, 1, bias=True, groups=4) params and the
    merged dense (Cout, 2C) weight matching the kernel's [x-channels | rel-channels] layout."""
    c2 = 2 * in_channels
    assert c2 % groups == 0 and out_channels % groups == 0
    cin_g = c2 // groups
    cout_g = out_channels // groups

    kw, kb = jax.random.split(key)
    bound = 1.0 / np.sqrt(cin_g)                                   # kaiming_uniform-style bound
    w = jax.random.uniform(kw, (out_channels, cin_g), jnp.float32, -bound, bound)
    w = w.astype(jnp.bfloat16).astype(jnp.float32)                 # bf16-representable weights
    b = jax.random.uniform(kb, (out_channels,), jnp.float32, -bound, bound)

    # Dense (2C, Cout) block-diagonal weight.  PyTorch's interleaved global input channel
    # gidx = 2*c + {0:x, 1:rel} maps to row (gidx//2) + (gidx%2)*C in the kernel's layout.
    wd = np.zeros((c2, out_channels), np.float32)
    w_np = np.asarray(w)
    for co in range(out_channels):
        g = co // cout_g
        for ci in range(cin_g):
            gidx = g * cin_g + ci
            row = (gidx // 2) + (gidx % 2) * in_channels
            wd[row, co] = w_np[co, ci]
    wT = jnp.asarray(wd.T)       # (Cout, 2C): cols 0..C-1 act on x, cols C..2C-1 on rel
    return wT, jnp.asarray(b), w, b


def reference(x_nchw, edge_index, w, b, out_channels, groups=4):
    """Pure-JAX f32 mirror of MRConv.forward (y=None, conv_op=nn.Conv3d, act='relu', norm=None)."""
    B, C, N, _ = x_nchw.shape
    K = edge_index.shape[-1]
    x = x_nchw[..., 0]                                             # (B, C, N)

    def gather(feat, idx):                                         # batched_index_select
        feat_e = jnp.broadcast_to(feat[:, :, None, :], (B, C, N, N))
        idx_e = jnp.broadcast_to(idx[:, None, :, :], (B, C, N, K))
        return jnp.take_along_axis(feat_e, idx_e, axis=-1)         # (B, C, N, K)

    x_i = gather(x, edge_index[1])
    x_j = gather(x, edge_index[0])
    rel = jnp.max(x_j - x_i, axis=-1)                              # (B, C, N)
    z = jnp.stack([x, rel], axis=2).reshape(B, 2 * C, N)           # interleaved channels

    cin_g = 2 * C // groups
    cout_g = out_channels // groups
    outs = []
    for g in range(groups):
        zg = z[:, g * cin_g:(g + 1) * cin_g]
        wg = w[g * cout_g:(g + 1) * cout_g]
        outs.append(jnp.einsum('oc,bcn->bon', wg, zg))
    out = jnp.concatenate(outs, axis=1) + b[None, :, None]
    return jnp.maximum(out, 0.0)[..., None, None]                  # (B, Cout, N, 1, 1)


if __name__ == "__main__":
    # TODO(synk): the optional `y` argument (second feature set) of MRConv.forward is not wired
    # through; only the y=None path (as used by the default GraphConv call) is implemented.
    key = jax.random.PRNGKey(0)

    # --- case 1: small graph, general edge_index (both rows random) ------------------------
    B, C, N, K, Cout = 2, 8, 16, 4, 16
    k1, k2, k3, key = jax.random.split(key, 4)
    x = jax.random.normal(k1, (B, C, N, 1), jnp.float32).astype(jnp.bfloat16).astype(jnp.float32)
    edge_index = jax.random.randint(k2, (2, B, N, K), 0, N, jnp.int32)
    wT, bias, w_pt, b_pt = init_params(k3, C, Cout)

    out = jax.block_until_ready(graph_conv_forward(x, edge_index, wT, bias))
    ref = reference(x, edge_index, w_pt, b_pt, Cout)
    assert out.shape == (B, Cout, N, 1, 1)
    np.testing.assert_allclose(np.asarray(out), np.asarray(ref), rtol=2e-2, atol=2e-2)

    # --- case 2: N % 128 != 0 (padding path), dense-kNN self-centered graph (fast path),
    #             chunked K, multi-tile grid -----------------------------------------------
    B2, C2, N2, K2, Cout2 = 1, 8, 200, 3, 8
    k1, k2, k3, key = jax.random.split(key, 4)
    x2 = jax.random.normal(k1, (B2, C2, N2, 1), jnp.float32).astype(jnp.bfloat16).astype(jnp.float32)
    idx_j = jax.random.randint(k2, (1, B2, N2, K2), 0, N2, jnp.int32)
    idx_i = jnp.broadcast_to(jnp.arange(N2, dtype=jnp.int32)[None, None, :, None],
                             (1, B2, N2, K2))
    edge_index2 = jnp.concatenate([idx_j, idx_i], axis=0)
    wT2, bias2, w_pt2, b_pt2 = init_params(k3, C2, Cout2)

    out2 = jax.block_until_ready(
        graph_conv_forward(x2, edge_index2, wT2, bias2, k_block=2, center_is_self=True))
    ref2 = reference(x2, edge_index2, w_pt2, b_pt2, Cout2)
    assert out2.shape == (B2, Cout2, N2, 1, 1)
    np.testing.assert_allclose(np.asarray(out2), np.asarray(ref2), rtol=2e-2, atol=2e-2)

    print("KERNEL_OK")
</pallas_src>

<mosaic_0001>
module attributes {stable_mosaic.version = 11 : i64} {
  func.func @kernel(%arg0: i32, %arg1: i32, %arg2: memref<1x1x2x64xi32, #tpu.memory_space<vmem>>, %arg3: memref<1x8x16xbf16, #tpu.memory_space<vmem>>, %arg4: memref<16x16xbf16, #tpu.memory_space<vmem>>, %arg5: memref<16x1xf32, #tpu.memory_space<vmem>>, %arg6: memref<1x16x16xf32, #tpu.memory_space<vmem>>) attributes {dimension_semantics = [#tpu.dimension_semantics<parallel>, #tpu.dimension_semantics<parallel>], iteration_bounds = array<i64: 2, 1>, scalar_prefetch = 0 : i64, scratch_operands = 0 : i64, tpu.core_type = #tpu.core_type<tc>, window_params = [{transform_indices = @transform_0, window_bounds = array<i64: 1, 1, 2, 64>}, {transform_indices = @transform_1, window_bounds = array<i64: 1, 8, 16>}, {pipeline_mode = #tpu.pipeline_mode<synchronous>, transform_indices = @transform_2, window_bounds = array<i64: 16, 16>}, {pipeline_mode = #tpu.pipeline_mode<synchronous>, transform_indices = @transform_3, window_bounds = array<i64: 16, 1>}, {transform_indices = @transform_4, window_bounds = array<i64: 1, 16, 16>}]} {
    %c0 = arith.constant 0 : index
    %c0_0 = arith.constant 0 : index
    %c0_1 = arith.constant 0 : index
    %0 = vector.load %arg3[%c0, %c0_0, %c0_1] : memref<1x8x16xbf16, #tpu.memory_space<vmem>>, vector<1x8x16xbf16>
    %1 = vector.shape_cast %0 : vector<1x8x16xbf16> to vector<8x16xbf16>
    %c0_2 = arith.constant 0 : index
    %c0_3 = arith.constant 0 : index
    %c0_4 = arith.constant 0 : index
    %c0_5 = arith.constant 0 : index
    %2 = vector.load %arg2[%c0_2, %c0_3, %c0_4, %c0_5] : memref<1x1x2x64xi32, #tpu.memory_space<vmem>>, vector<1x1x2x64xi32>
    %3 = vector.shape_cast %2 : vector<1x1x2x64xi32> to vector<2x64xi32>
    %4 = tpu.iota {dimensions = array<i32: 0>} : vector<16x64xi32>
    %5 = vector.extract_strided_slice %3 {offsets = [0, 0], sizes = [1, 64], strides = [1, 1]} : vector<2x64xi32> to vector<1x64xi32>
    %6 = vector.broadcast %5 : vector<1x64xi32> to vector<16x64xi32>
    %7 = arith.cmpi eq, %4, %6 : vector<16x64xi32>
    %8 = arith.extui %7 : vector<16x64xi1> to vector<16x64xi32>
    %9 = arith.sitofp %8 : vector<16x64xi32> to vector<16x64xf32>
    %10 = arith.truncf %9 : vector<16x64xf32> to vector<16x64xbf16>
    %11 = vector.extract_strided_slice %3 {offsets = [1, 0], sizes = [1, 64], strides = [1, 1]} : vector<2x64xi32> to vector<1x64xi32>
    %12 = vector.broadcast %11 : vector<1x64xi32> to vector<16x64xi32>
    %13 = arith.cmpi eq, %4, %12 : vector<16x64xi32>
    %14 = arith.extui %13 : vector<16x64xi1> to vector<16x64xi32>
    %15 = arith.sitofp %14 : vector<16x64xi32> to vector<16x64xf32>
    %16 = arith.truncf %15 : vector<16x64xf32> to vector<16x64xbf16>
    %17 = arith.subf %10, %16 : vector<16x64xbf16>
    %cst = arith.constant dense<0.000000e+00> : vector<8x64xf32>
    %18 = tpu.matmul %1, %17, %cst {dimension_numbers = #tpu.dot_dimension_numbers<[1], [0], [0], [1], [0, 0, 1, 1], [], []>} : vector<8x16xbf16>, vector<16x64xbf16>, vector<8x64xf32> -> vector<8x64xf32>
    %19 = vector.extract_strided_slice %18 {offsets = [0, 0], sizes = [8, 16], strides = [1, 1]} : vector<8x64xf32> to vector<8x16xf32>
    %20 = vector.extract_strided_slice %18 {offsets = [0, 16], sizes = [8, 16], strides = [1, 1]} : vector<8x64xf32> to vector<8x16xf32>
    %21 = arith.maximumf %19, %20 : vector<8x16xf32>
    %22 = vector.extract_strided_slice %18 {offsets = [0, 32], sizes = [8, 16], strides = [1, 1]} : vector<8x64xf32> to vector<8x16xf32>
    %23 = arith.maximumf %21, %22 : vector<8x16xf32>
    %24 = vector.extract_strided_slice %18 {offsets = [0, 48], sizes = [8, 16], strides = [1, 1]} : vector<8x64xf32> to vector<8x16xf32>
    %25 = arith.maximumf %23, %24 : vector<8x16xf32>
    %26 = arith.extf %1 : vector<8x16xbf16> to vector<8x16xf32>
    %27 = tpu.concatenate %26, %25 in 0 : vector<8x16xf32>, vector<8x16xf32> -> vector<16x16xf32>
    %c0_6 = arith.constant 0 : index
    %c0_7 = arith.constant 0 : index
    %28 = vector.load %arg4[%c0_6, %c0_7] : memref<16x16xbf16, #tpu.memory_space<vmem>>, vector<16x16xbf16>
    %29 = arith.truncf %27 : vector<16x16xf32> to vector<16x16xbf16>
    %cst_8 = arith.constant dense<0.000000e+00> : vector<16x16xf32>
    %30 = tpu.matmul %28, %29, %cst_8 {dimension_numbers = #tpu.dot_dimension_numbers<[1], [0], [0], [1], [0, 0, 1, 1], [], []>} : vector<16x16xbf16>, vector<16x16xbf16>, vector<16x16xf32> -> vector<16x16xf32>
    %c0_9 = arith.constant 0 : index
    %c0_10 = arith.constant 0 : index
    %31 = vector.load %arg5[%c0_9, %c0_10] : memref<16x1xf32, #tpu.memory_space<vmem>>, vector<16x1xf32>
    %32 = vector.broadcast %31 : vector<16x1xf32> to vector<16x16xf32>
    %33 = arith.addf %30, %32 : vector<16x16xf32>
    %cst_11 = arith.constant 0.000000e+00 : f32
    %34 = vector.broadcast %cst_11 : f32 to vector<16x16xf32>
    %35 = arith.maximumf %33, %34 : vector<16x16xf32>
    %c0_12 = arith.constant 0 : index
    %c0_13 = arith.constant 0 : index
    %c0_14 = arith.constant 0 : index
    %36 = vector.load %arg6[%c0_12, %c0_13, %c0_14] : memref<1x16x16xf32, #tpu.memory_space<vmem>>, vector<1x16x16xf32>
    %37 = vector.shape_cast %36 : vector<1x16x16xf32> to vector<16x16xf32>
    %38 = vector.shape_cast %35 : vector<16x16xf32> to vector<1x16x16xf32>
    tpu.vector_store %arg6[%c0_12, %c0_13, %c0_14], %38 {strides = array<i32>} : memref<1x16x16xf32, #tpu.memory_space<vmem>>, vector<1x16x16xf32>,
    return
  }
  func.func @transform_0(%arg0: i32, %arg1: i32) -> (i32, i32, i32, i32) {
    %c0_i32 = arith.constant 0 : i32
    %c0_i32_0 = arith.constant 0 : i32
    %c0_i32_1 = arith.constant 0 : i32
    return %arg0, %arg1, %c0_i32, %c0_i32_0 : i32, i32, i32, i32
  }
  func.func @transform_1(%arg0: i32, %arg1: i32) -> (i32, i32, i32) {
    %c0_i32 = arith.constant 0 : i32
    %c0_i32_0 = arith.constant 0 : i32
    %c0_i32_1 = arith.constant 0 : i32
    return %arg0, %c0_i32, %c0_i32_0 : i32, i32, i32
  }
  func.func @transform_2(%arg0: i32, %arg1: i32) -> (i32, i32) {
    %c0_i32 = arith.constant 0 : i32
    %c0_i32_0 = arith.constant 0 : i32
    %c0_i32_1 = arith.constant 0 : i32
    return %c0_i32, %c0_i32_0 : i32, i32
  }
  func.func @transform_3(%arg0: i32, %arg1: i32) -> (i32, i32) {
    %c0_i32 = arith.constant 0 : i32
    %c0_i32_0 = arith.constant 0 : i32
    %c0_i32_1 = arith.constant 0 : i32
    return %c0_i32, %c0_i32_0 : i32, i32
  }
  func.func @transform_4(%arg0: i32, %arg1: i32) -> (i32, i32, i32) {
    %c0_i32 = arith.constant 0 : i32
    %c0_i32_0 = arith.constant 0 : i32
    return %arg0, %c0_i32, %arg1 : i32, i32, i32
  }
}

</mosaic_0001>

<bundles_post_ra>
// kernel: tpu_custom_call.1
= control target key start
LH: loop header
LB: loop body
LE: loop exit
PB: predicated region body
PF: predicated region fallthrough
CT: control target
= control target key end

     0   :  { %9 = vsyncpa [#allocation3], 0  ;;  %s937_s0 = inlined_call_operand.hbm [shape: s32[2,1,2,64], index: 0, kind: input, shape index: {}]   ;;  %s938_s1 = inlined_call_operand.vmem [shape: bf16[2,8,16], index: 1, kind: input, shape index: {}]   ;;  %s939_s2 = inlined_call_operand.vmem [shape: bf16[16,16], index: 2, kind: input, shape index: {}]   ;;  %s940_s3 = inlined_call_operand.vmem [shape: f32[16,1], index: 3, kind: input, shape index: {}]   ;;  %s941_s4 = inlined_call_operand.hbm [shape: f32[2,16,16], index: 4, kind: output, shape index: {}]  }
   0x1   :  { %11 = vsyncpa [#allocation3 + $0x1], 0 }
   0x2   :  { %12 = vsyncpa [#allocation4], 0 }
   0x3   :  { %14 = vsyncpa [#allocation4 + $0x1], 0  ;;  %s770_s15 = smov 0   ;;  %s772_s16 = smov 0  }
   0x4   :  { %s774_s17 = smov 0   ;;  %s776_s18 = smov 0  }
   0x5   :  { %s778_s19 = smov 0   ;;  %s780_s20 = smov 0  }
   0x6 LB: > { %s513_s21 = sadd.s32 4294967295, %s733_s20   ;;  %s514_s22 = sadd.s32 4294967294, %s733_s20   ;;  %s733_s20 = sphi %s780_s20, %s20_s20   ;;  %s729_s19 = sphi %s778_s19, %s953_s19   ;;  %s725_s18 = sphi %s776_s18, %s952_s18   ;;  %s721_s17 = sphi %s774_s17, %s951_s17   ;;  %s717_s16 = sphi %s772_s16, %s950_s16   ;;  %s713_s15 = sphi %s770_s15, %s949_s15  }
   0x7   : > { %s32_s23 = sadd.s32 1, %s729_s19  ;;  %s41_s24 = sadd.s32 1, %s721_s17 }
   0x8   : > { %p34_p0 = scmp.ge.s32.totalorder %s32_s23, 2  ;;  %p48_p1 = scmp.ne.s32.totalorder %s721_s17, %s717_s16 }
   0x9   : > { %p49_p2 = scmp.eq.s32.totalorder %s733_s20, 0  ;;  %p54_p3 = scmp.ne.s32.totalorder %s717_s16, %s713_s15 }
   0xa   : > { %s955_s23 = smov (%p34_p0, %s32_s23), 0  ;;  %p55_p5 = scmp.eq.s32.totalorder %s513_s21, 0 }
   0xb   : > { %p811_p4 = por %p49_p2, %p48_p1  ;;  %s36_s26 = ssub.s32 %s729_s19, %s955_s23 }
   0xc   : > { %p148_p6 = scmp.eq.s32.totalorder %s513_s21, 1  ;;  %p39_p7 = scmp.eq.s32.totalorder %s36_s26, 0 }
   0xd   : > { %p817_p8 = por %p55_p5, %p54_p3  ;;  %p154_p10 = scmp.eq.s32.totalorder %s514_s22, 1 }
   0xe   : > { %p821_p9 = por %p148_p6, %p48_p1  ;;  %p564_p13 = scmp.lt.s32.totalorder %s733_s20, 2 }
   0xf   : > { %s826_s29 = scalar_select %p39_p7, %s721_s17, %s41_s24  }
  0x10   : > { %p828_p11 = por %p154_p10, %p54_p3  ;;  %s180_s5 = sand.u32 1, %s721_s17  }
  0x11   : > { %s517_s6 = sshll.u32 %s180_s5, 1  ;;  %s518_s7 = sshll.u32 %s729_s19, 5 }
  0x12   : > { %s945_s30 = scalar_select %p828_p11, 1, 0 }
  0x13   : > { %s190_s10 = scalar_lea.hbm %s937_s0, %s518_s7  ;;  %s184_s11 = scalar_lea.vmem [#allocation2], %s517_s6 }
  0x14   : > { %s192_s12 = sshll.u32 %s184_s11, 4  ;;  %p841_p0 = pnand %p564_p13, %p811_p4  ;;  %s193_s12 = int_to_ptr.vmem [resolvable:$true] %s192_s12 }
  0x15   : > { %p519_p1 = scmp.ge.s32.totalorder %s733_s20, 1  ;;  %p204_p2 = scmp.lt.s32.totalorder %s733_s20, 3 }
  0x16   : > { %s181_s14 = scalar_lea.sflag [#allocation3], %s180_s5  ;;  %p627_p3 = pneg %p841_p0 }
  0x17   : > { %s638_s21 = scalar_lea.vmem %s193_s12, 32  ;;  %s735_s22 = smov [#allocation2]  }
  0x18   : > { %p639_p5 = scmp.ne.s32.totalorder %s193_s12, %s638_s21  ;;  %s643_s24 = sshll.u32 %s735_s22, 4  ;;  %s644_s24 = int_to_ptr.vmem [resolvable:$false] %s643_s24 }
  0x19   : > { %s645_s26 = scalar_lea.vmem %s644_s24, 64  ;;  %p646_p10 = scmp.lt.s32.totalorder %s193_s12, %s644_s24 }
  0x1a   : > { %p641_p6 = pnand %p639_p5, %p627_p3  ;;  %p647_p12 = scmp.lt.s32.totalorder %s645_s26, %s638_s21 }
  0x1c   : > { %p642_p7 = pneg %p641_p6  ;;  %p648_p4 = por %p647_p12, %p646_p10 }
  0x1e   : > { %p649_p13 = pnand %p648_p4, %p642_p7 }
  0x20   : > { %652 = shalt.err (!%p649_p13)
}
  0x21   : > { %559 = dma.hbm_to_vmem [thread:$0]  (!%p841_p0), %s190_s10, 32, %s193_s12, %s181_s14  }
  0x22   : > { %p205_p11 = pnand %p519_p1, %p204_p2 }
  0x23   : > { %s856_s25 = sand.u32 (!%p205_p11), 1, %s717_s16  }
  0x24   : > { %208 = sbr.rel (%p205_p11) target bundleno = 595 (0x253), region = 36  ;;  %s520_s5 = sshll.u32 (!%p205_p11), %s856_s25, 1 }
  0x25   : > { %s211_s6 = scalar_lea.sflag (!%p205_p11), [#allocation3], %s856_s25  ;;  %s214_s7 = scalar_lea.vmem (!%p205_p11), [#allocation2], %s520_s5 }
  0x29   : > { %704 = dma.done.wait (%p817_p8), %s211_s6, 32  }
  0x2a   : > { %706 = vsyncadd (%p817_p8), %s211_s6, 4294967264  ;;  %v250_v0 = vlaneseq  ;;  %v736_v1 = vmov 0.0   ;;  %vm737_vm0 = vmmov 0   ;;  %p243_p11 = scmp.lt.s32.totalorder %s725_s18, 1  ;;  %v249_v6 = vld [vmem:[%s214_s7] sm:$0x3] }
  0x2b   : > { %540 = vmatprep.subr.bf16.mxu0 %v736_v1  ;;  %542 = vmatprep.mubr.msk.bf16.mxu0 %vm737_vm0, %v736_v1  ;;  %vm276_vm5 = vcmask 130048   ;;  %s738_s12 = smov 80   ;;  %s739_s13 = smov 112   ;;  %v740_v19 = vmov 0   ;;  %v337_v20 = vld [vmem:[%s940_s3] sm:$0xff]  ;;  %v338_v23 = vld [vmem:[%s940_s3 + $0x8] sm:$0xff] }
  0x2c   : > { %v251_v2 = vshrl.u32 %v250_v0, 7  ;;  %546 = vmatprep.subr.bf16.mxu1 %v736_v1  ;;  %548 = vmatprep.mubr.msk.bf16.mxu1 %vm737_vm0, %v736_v1  ;;  %s244_s8 = scalar_select %p243_p11, %s725_s18, 1  ;;  %v624_v32 = vld [vmem:[%s939_s2] sm:$0xff]  }
  0x2d   : > { %622 = vset.pattern.permute.xlu1 %v740_v19  ;;  %623 = vset.pattern.permute.xlu0 %v740_v19  ;;  %s741_s22 = smov 96   ;;  %s521_s7 = sshll.u32 %s856_s25, 4 }
  0x2e   : > { %v255_v3 = vsub.s32 0, %v251_v2  ;;  %v266_v4 = vsub.s32 1, %v251_v2  ;;  %v252_v5 = vadd.s32 8, %v251_v2  ;;  %s522_s27 = sshll.u32 %s244_s8, 2  ;;  %s242_s8 = scalar_lea.vmem [#allocation5], %s521_s7 }
  0x2f   : > { %s246_s11 = scalar_lea.vmem %s938_s1, %s522_s27  ;;  %s417_s27 = sshll.u32 %s242_s8, 4  ;;  %s888_s27 = int_to_ptr.vmem [resolvable:$true] %s417_s27 }
  0x30   : > { %v256_v7 = vrot.slane %v249_v6, %v255_v3  ;;  %v267_v8 = vrot.slane %v249_v6, %v266_v4  ;;  %v248_v16 = vld [vmem:[%s246_s11] sm:$0xf]  ;;  %s535_s9 = sshll.u32 %s725_s18, 8  ;;  %s653_s18 = scalar_lea.vmem %s888_s27, 256 }
  0x31   : > { %v333_v28 = vunpack.c.l.bf16 %v248_v16  ;;  %p654_p8 = scmp.ne.s32.totalorder %s888_s27, %s653_s18  ;;  %s742_s14 = smov [#allocation5]  }
  0x32   : > { %vm257_vm1 = vcmp.eq.s32.totalorder %v251_v2, %v256_v7  ;;  %vm258_vm2 = vcmp.eq.s32.totalorder %v252_v5, %v256_v7  ;;  %vm268_vm3 = vcmp.eq.s32.totalorder %v251_v2, %v267_v8  ;;  %vm269_vm4 = vcmp.eq.s32.totalorder %v252_v5, %v267_v8  ;;  %s657_s21 = sshll.u32 %s742_s14, 4  ;;  %s658_s21 = int_to_ptr.vmem [resolvable:$false] %s657_s21 }
  0x33   : > { %v523_v9 = vsel %vm257_vm1, 1.0, %v736_v1  ;;  %v524_v10 = vsel %vm258_vm2, 1.0, %v736_v1  ;;  %v525_v11 = vsel %vm268_vm3, 1.0, %v736_v1  ;;  %v526_v12 = vsel %vm269_vm4, 1.0, %v736_v1  ;;  %p655_p12 = pnand %p654_p8, %p821_p9  ;;  %p660_p1 = scmp.lt.s32.totalorder %s888_s27, %s658_s21 }
  0x34   : > { %v263_v13 = vpack.c.bf16 %v524_v10, %v523_v9  ;;  %v274_v14 = vpack.c.bf16 %v526_v12, %v525_v11 }
  0x35   : > { %p656_p0 = pneg %p655_p12 }
  0x36   : > { %v275_v15 = vsub.bf16 %v263_v13, %v274_v14 }
  0x38   : > { %541 = vmatpush3.bf16.msra.mxu0 %v275_v15 }
  0x3b   : > { %543 = vmatmul.mubr.msk.bf16.vlgmr.msra.gmra.mxu0 %vm276_vm5, %v248_v16 }
  0xfb   : > { %v314_v17 = vpop.f32.mrf.mxu0 }
  0xfc   : > { %329 = vrot.lane.b32.xlu1 %v314_v17, %s738_s12  ;;  %321 = vrot.lane.b32.xlu0 %v314_v17, %s739_s13  ;;  %s886_s12 = scalar_lea.hbm %s941_s4, %s535_s9  ;;  %s403_s13 = scalar_lea.sflag [#allocation4], %s856_s25 }
  0xfd   : > { %v544_v18 = vpop.f32.mrf.mxu0 }
  0xff   : > { %v317_v21 = vpop.f32.mrf.mxu0 }
 0x100   : > { %325 = vrot.lane.b32.xlu0 %v314_v17, %s741_s22  ;;  %341 = vperm.xlu1 %622, %v337_v20   ;;  %s659_s22 = scalar_lea.vmem %s658_s21, 512 }
 0x101   : > { %v545_v22 = vpop.f32.mrf.mxu0  ;;  %p661_p2 = scmp.lt.s32.totalorder %s659_s22, %s653_s18 }
 0x103   : > { %p662_p3 = por %p661_p2, %p660_p1 }
 0x104   : > { %346 = vperm.xlu0 %623, %v338_v23  }
 0x105   : > { %p663_p5 = pnand %p662_p3, %p656_p0 }
 0x16e   : > { %v322_v24 = vpop.permute.xlu0 %321  ;;  %v330_v29 = vpop.permute.xlu1 %329 }
 0x16f   : > { %v324_v25 = vmax.f32 %v314_v17, %v322_v24 }
 0x172   : > { %v326_v26 = vpop.permute.xlu0 %325 }
 0x173   : > { %v328_v27 = vmax.f32 %v324_v25, %v326_v26 }
 0x175   : > { %v332_v30 = vmax.f32 %v328_v27, %v330_v29 }
 0x177   : > { %v336_v31 = vpack.c.bf16 %v332_v30, %v333_v28 }
 0x179   : > { %547 = vmatpush3.bf16.msra.mxu1 %v336_v31 }
 0x17b   : > { %v342_v33 = vpop.permute.xlu1 %341 }
 0x17c   : > { %549 = vmatmul.mubr.msk.bf16.vlgmr.msra.gmra.mxu1 %vm276_vm5, %v624_v32 }
 0x17f   : > { %v347_v37 = vpop.permute.xlu0 %346 }
 0x23c   : > { %v391_v34 = vpop.f32.mrf.mxu1 }
 0x23d   : > { %v392_v35 = vadd.f32 %v391_v34, %v342_v33 }
 0x23e   : > { %v550_v36 = vpop.f32.mrf.mxu1 }
 0x23f   : > { %v398_v38 = vmax.f32 %v392_v35, 0.0 }
 0x240   : > { %v394_v39 = vpop.f32.mrf.mxu1 }
 0x241   : > { %400 = vst.msk [vmem:[%s242_s8] sm:$0xff] %vm276_vm5, %v398_v38  ;;  %v395_v40 = vadd.f32 %v394_v39, %v347_v37 }
 0x242   : > { %v551_v41 = vpop.f32.mrf.mxu1 }
 0x243   : > { %v399_v42 = vmax.f32 %v395_v40, 0.0 }
 0x245   : > { %401 = vst.msk [vmem:[%s242_s8 + $0x8] sm:$0xff] %vm276_vm5, %v399_v42 }
 0x246   : > { %666 = shalt.err (!%p663_p5)
}
 0x247   : > { %s667_s24 = scalar_lea.hbm %s886_s12, 256  ;;  %s671_s6 = scalar_lea.hbm %s941_s4, 512 }
 0x248   : > { %p668_p6 = scmp.ne.s32.totalorder %s886_s12, %s667_s24  ;;  %p672_p4 = scmp.lt.s32.totalorder %s886_s12, %s941_s4 }
 0x249   : > { %p673_p13 = scmp.lt.s32.totalorder %s671_s6, %s667_s24 }
 0x24a   : > { %p669_p7 = pnand %p668_p6, %p821_p9 }
 0x24b   : > { %p674_p11 = por %p673_p13, %p672_p4 }
 0x24c   : > { %p670_p10 = pneg %p669_p7 }
 0x24e   : > { %p675_p8 = pnand %p674_p11, %p670_p10 }
 0x250   : > { %678 = shalt.err (!%p675_p8)
}
 0x251   : > { %s743_s9 = smov 128   ;;  %s744_s10 = smov 8  }
 0x252   : > { %554 = dma.vmem_to_hbm [thread:$0]  (%p821_p9), %s888_s27, 256, %s886_s12, %s403_s13, %s743_s9, %s743_s9, %s744_s10  }
 0x253 PF: > { %s432_s11 = sand.u32 1, %s713_s15   ;;  %p947_p12 = scmp.ne.s32.totalorder %s945_s30, 0 }
 0x254   : > { %p948_p0 = scmp.ge.s32.totalorder %s733_s20, 2  ;;  %s433_s18 = scalar_lea.sflag [#allocation4], %s432_s11 }
 0x256   : > { %p561_p1 = pnand %p948_p0, %p947_p12 }
 0x258   : > { %p562_p2 = pneg %p561_p1 }
 0x25a   : > { %708 = dma.done.wait (%p562_p2), %s433_s18, 256  }
 0x25b   : > { %710 = vsyncadd (%p562_p2), %s433_s18, 4294967040  ;;  %s20_s20 = sadd.s32 1, %s733_s20   ;;  %s949_s15 = smov %s717_s16 }
 0x25c   : > { %p17_p3 = scmp.ge.s32.totalorder %s20_s20, 4   ;;  %s950_s16 = smov %s721_s17 }
 0x25d   : > { %s951_s17 = smov %s826_s29  ;;  %s952_s18 = smov %s729_s19 }
 0x25e   : > { %s953_s19 = smov %s955_s23  ;;  %19 = sbr.rel (!%p17_p3) target bundleno = 6 (0x6), region = 84 }
 0x263   :  { %438 = vsyncpa [#allocation3], 1 }
 0x264   :  { %440 = vsyncpa [#allocation3 + $0x1], 1 }
 0x265   :  { %441 = vsyncpa [#allocation4], 1 }
 0x266   :  { %443 = vsyncpa [#allocation4 + $0x1], 1 }

</bundles_post_ra>
